<compile_context>
chip_gen: v5e
topology: v5e:2x2
jax: 0.10.0
libtpu: 0.0.40
codegen_flags: <defaults>
</compile_context>

<pallas_src>
import functools

import jax
import jax.numpy as jnp
from jax.experimental import pallas as pl
from jax.experimental.pallas import tpu as pltpu


def _vmem_capacity_bytes():
    """Physical VMEM per TensorCore; conservative (v7x) fallback."""
    try:
        info = pltpu.get_tpu_info()
        for attr in ("vmem_capacity_bytes", "vmem_bytes", "vmem_size_bytes"):
            v = getattr(info, attr, None)
            if v:
                return int(v)
    except Exception:
        pass
    return 64 * 1024 * 1024


def _se_kernel(x_ref, w1_ref, w2_ref, o_ref, *,
               hw_true, hw_chunk, n_hw_chunks, hw_rem):
    # x_ref / o_ref: (Bt, C, HW)   w1_ref: (C, C//r)   w2_ref: (C//r, C)
    Bt, C, _ = x_ref.shape
    d = hw_chunk // 128
    tail_off = n_hw_chunks * hw_chunk          # static Python int

    unroll = True if n_hw_chunks <= 8 else 4   # short loops fully unrolled

    # --- Phase 1: global average pool -------------------------------------
    # Lane-resident f32 partial sums: per chunk only VPU adds (plus a cast for
    # sub-f32 inputs); one cross-lane reduce after the loop.
    ssum = jnp.zeros((Bt, C), jnp.float32)
    if n_hw_chunks > 0:
        def mean_body(j, acc):
            off = pl.multiple_of(j * hw_chunk, hw_chunk)
            chunk = x_ref[:, :, pl.ds(off, hw_chunk)]
            for g in range(d):                 # static, lane-aligned groups
                acc = acc + chunk[:, :, g * 128:(g + 1) * 128].astype(jnp.float32)
            return acc

        acc = jax.lax.fori_loop(
            0, n_hw_chunks, mean_body,
            jnp.zeros((Bt, C, 128), jnp.float32), unroll=unroll)
        ssum = ssum + jnp.sum(acc, axis=-1)
    if hw_rem > 0:
        # Static masked tail (HW % 128): handled in-kernel, no wrapper padding.
        tail = x_ref[:, :, pl.ds(tail_off, hw_rem)].astype(jnp.float32)
        ssum = ssum + jnp.sum(tail, axis=-1)
    y = ssum * (1.0 / float(hw_true))                          # (Bt, C)

    # --- Excitation: batched FC -> ReLU -> FC -> sigmoid (f32) -------------
    h = jnp.dot(y, w1_ref[...].astype(jnp.float32),
                preferred_element_type=jnp.float32)            # (Bt, C//r)
    h = jnp.maximum(h, 0.0)
    s = jnp.dot(h, w2_ref[...].astype(jnp.float32),
                preferred_element_type=jnp.float32)            # (Bt, C)
    gate = jax.nn.sigmoid(s)

    # --- Phase 2: streaming per-channel rescale -----------------------------
    # Cast + lane-broadcast the gate ONCE (hoisted out of the loop); the loop
    # body is a native-dtype load * mul * store.
    bcast_w = hw_chunk if n_hw_chunks > 0 else max(hw_rem, 1)
    gate_b = jnp.broadcast_to(gate.astype(o_ref.dtype)[:, :, None],
                              (Bt, C, bcast_w))

    if n_hw_chunks > 0:
        def scale_body(j, carry):
            off = pl.multiple_of(j * hw_chunk, hw_chunk)
            o_ref[:, :, pl.ds(off, hw_chunk)] = (
                x_ref[:, :, pl.ds(off, hw_chunk)] * gate_b)
            return carry

        jax.lax.fori_loop(0, n_hw_chunks, scale_body, 0, unroll=unroll)
    if hw_rem > 0:
        o_ref[:, :, pl.ds(tail_off, hw_rem)] = (
            x_ref[:, :, pl.ds(tail_off, hw_rem)] * gate_b[:, :, :hw_rem])


def se_layer(x, w1, w2):
    """x: (B, C, H, W); w1: (C, C//r); w2: (C//r, C). Returns (B, C, H, W)."""
    B, C, H, W = x.shape
    HW = H * W
    Cr = w1.shape[1]
    itemsize = jnp.dtype(x.dtype).itemsize

    # Metadata-only reshape: no pad, no extra HBM copy.
    x_flat = x.reshape(B, C, HW)

    # ---- Generation-aware VMEM budgeting ----------------------------------
    vmem_cap = _vmem_capacity_bytes()
    w_bytes = (w1.size * jnp.dtype(w1.dtype).itemsize
               + w2.size * jnp.dtype(w2.dtype).itemsize)
    headroom = 2 * 1024 * 1024
    # in + out blocks, each double-buffered -> 4 * block_bytes, plus weights.
    block_budget = max((int(0.75 * vmem_cap) - 2 * w_bytes - headroom) // 4,
                       1 * 1024 * 1024)

    slab_bytes = C * HW * itemsize

    # ---- Batch tile: largest divisor of B under the budget, preferring an
    # even number of grid steps (v7x megacore) and >= 2 steps (pipelining). ---
    divisors = [t for t in range(1, B + 1) if B % t == 0]
    fitting = [t for t in divisors if t * slab_bytes <= block_budget] or [1]
    even_pipe = [t for t in fitting if (B // t) >= 2 and (B // t) % 2 == 0]
    pipe = [t for t in fitting if (B // t) >= 2]
    Bt = max(even_pipe) if even_pipe else (max(pipe) if pipe else max(fitting))
    grid_b = B // Bt

    # ---- In-kernel spatial chunk: multiple of 128 lanes dividing HW//128;
    # budget computed from the f32-promoted working set. ---------------------
    n128 = HW // 128
    hw_rem = HW % 128
    chunk_budget = 64 * 1024
    d = 1
    for cand in range(1, max(n128, 1) + 1):
        if n128 > 0 and n128 % cand == 0 and Bt * C * 128 * cand * 4 <= chunk_budget:
            d = cand
    hw_chunk = 128 * d
    n_hw_chunks = (n128 // d) if n128 > 0 else 0

    # ---- Explicit VMEM limit, clamped below physical capacity (v7x-safe). --
    block_bytes = Bt * slab_bytes
    vmem_need = 4 * block_bytes + 2 * w_bytes + headroom
    vmem_limit = min(max(vmem_need, 32 * 1024 * 1024), int(0.9 * vmem_cap))
    vmem_limit = int(max(vmem_limit, vmem_need))

    kernel = functools.partial(
        _se_kernel, hw_true=HW, hw_chunk=hw_chunk,
        n_hw_chunks=n_hw_chunks, hw_rem=hw_rem)

    out_flat = pl.pallas_call(
        kernel,
        out_shape=jax.ShapeDtypeStruct((B, C, HW), x.dtype),
        grid_spec=pltpu.PrefetchScalarGridSpec(
            num_scalar_prefetch=0,
            grid=(grid_b,),
            in_specs=[
                pl.BlockSpec((Bt, C, HW), lambda b: (b, 0, 0)),
                # Constant index_map -> weights are fetched once; their VMEM
                # footprint is negligible (C * C//r elements).
                pl.BlockSpec((C, Cr), lambda b: (0, 0)),
                pl.BlockSpec((Cr, C), lambda b: (0, 0)),
            ],
            out_specs=pl.BlockSpec((Bt, C, HW), lambda b: (b, 0, 0)),
        ),
        compiler_params=pltpu.CompilerParams(
            dimension_semantics=("parallel",),
            vmem_limit_bytes=vmem_limit,
        ),
    )(x_flat, w1, w2)

    return out_flat.reshape(B, C, H, W)


def se_layer_ref(x, w1, w2):
    """Pure-JAX reference matching the PyTorch forward."""
    y = jnp.mean(x, axis=(2, 3))                 # (B, C)
    h = jnp.maximum(y @ w1, 0.0)                 # (B, C//r)
    s = jax.nn.sigmoid(h @ w2)                   # (B, C)
    return x * s[:, :, None, None]


if __name__ == "__main__":
    # channel must be >= reduction for the torch module to make sense.
    B, C, H, W = 2, 32, 16, 16       # HW = 256 -> fully lane-aligned path
    reduction = 16
    Cr = C // reduction

    key = jax.random.PRNGKey(0)
    kx, k1, k2 = jax.random.split(key, 3)
    x = jax.random.normal(kx, (B, C, H, W), dtype=jnp.float32)

    # PyTorch nn.Linear stores weight as (out, in) and computes y @ W.T; here
    # we directly materialize the transposed (in, out) matrices.
    w1 = jax.random.normal(k1, (C, Cr), dtype=jnp.float32) * 0.1   # fc1: C -> C//r
    w2 = jax.random.normal(k2, (Cr, C), dtype=jnp.float32) * 0.1   # fc2: C//r -> C

    out = se_layer(x, w1, w2)
    jax.block_until_ready(out)
    ref = se_layer_ref(x, w1, w2)
    assert out.shape == (B, C, H, W)
    assert jnp.allclose(out, ref, atol=1e-5, rtol=1e-5), "mismatch vs reference"

    # Non-128-multiple spatial size: exercises the in-kernel masked tail path
    # (no wrapper-side pad / slice, no extra HBM copies).
    x2 = jax.random.normal(jax.random.PRNGKey(1), (B, C, 7, 7), dtype=jnp.float32)
    out2 = se_layer(x2, w1, w2)
    jax.block_until_ready(out2)
    ref2 = se_layer_ref(x2, w1, w2)
    assert out2.shape == (B, C, 7, 7)
    assert jnp.allclose(out2, ref2, atol=1e-5, rtol=1e-5), "mismatch (tail path)"

    print("KERNEL_OK")
</pallas_src>

<mosaic_0001>
module attributes {stable_mosaic.version = 11 : i64} {
  func.func @_se_kernel(%arg0: i32, %arg1: memref<1x32x256xf32, #tpu.memory_space<vmem>>, %arg2: memref<32x2xf32, #tpu.memory_space<vmem>>, %arg3: memref<2x32xf32, #tpu.memory_space<vmem>>, %arg4: memref<1x32x256xf32, #tpu.memory_space<vmem>>) attributes {dimension_semantics = [#tpu.dimension_semantics<parallel>], iteration_bounds = array<i64: 2>, scalar_prefetch = 0 : i64, scratch_operands = 0 : i64, tpu.core_type = #tpu.core_type<tc>, window_params = [{transform_indices = @transform_0, window_bounds = array<i64: 1, 32, 256>}, {pipeline_mode = #tpu.pipeline_mode<synchronous>, transform_indices = @transform_1, window_bounds = array<i64: 32, 2>}, {pipeline_mode = #tpu.pipeline_mode<synchronous>, transform_indices = @transform_2, window_bounds = array<i64: 2, 32>}, {transform_indices = @transform_3, window_bounds = array<i64: 1, 32, 256>}]} {
    %cst = arith.constant 0.000000e+00 : f32
    %0 = vector.broadcast %cst : f32 to vector<1x32xf32>
    %cst_0 = arith.constant 0.000000e+00 : f32
    %1 = vector.broadcast %cst_0 : f32 to vector<1x32x128xf32>
    %c0_i32 = arith.constant 0 : i32
    %c256_i32 = arith.constant 256 : i32
    %2 = arith.muli %c0_i32, %c256_i32 : i32
    %3 = tpu.assume_multiple %2, 256 : i32
    %c0 = arith.constant 0 : index
    %c0_1 = arith.constant 0 : index
    %4 = arith.index_cast %3 : i32 to index
    %5 = vector.load %arg1[%c0, %c0_1, %4] : memref<1x32x256xf32, #tpu.memory_space<vmem>>, vector<1x32x256xf32>
    %6 = vector.extract_strided_slice %5 {offsets = [0, 0, 0], sizes = [1, 32, 128], strides = [1, 1, 1]} : vector<1x32x256xf32> to vector<1x32x128xf32>
    %7 = arith.addf %1, %6 : vector<1x32x128xf32>
    %8 = vector.extract_strided_slice %5 {offsets = [0, 0, 128], sizes = [1, 32, 128], strides = [1, 1, 1]} : vector<1x32x256xf32> to vector<1x32x128xf32>
    %9 = arith.addf %7, %8 : vector<1x32x128xf32>
    %c1_i32 = arith.constant 1 : i32
    %cst_2 = arith.constant dense<0.000000e+00> : vector<1x32xf32>
    %10 = vector.multi_reduction <add>, %9, %cst_2 [2] : vector<1x32x128xf32> to vector<1x32xf32>
    %11 = arith.addf %0, %10 : vector<1x32xf32>
    %cst_3 = arith.constant 3.906250e-03 : f32
    %12 = vector.broadcast %cst_3 : f32 to vector<1x32xf32>
    %13 = arith.mulf %11, %12 : vector<1x32xf32>
    %c0_4 = arith.constant 0 : index
    %c0_5 = arith.constant 0 : index
    %14 = vector.load %arg2[%c0_4, %c0_5] : memref<32x2xf32, #tpu.memory_space<vmem>>, vector<32x2xf32>
    %cst_6 = arith.constant dense<0.000000e+00> : vector<1x2xf32>
    %15 = tpu.matmul %13, %14, %cst_6 {dimension_numbers = #tpu.dot_dimension_numbers<[1], [0], [0], [1], [0, 0, 1, 1], [], []>} : vector<1x32xf32>, vector<32x2xf32>, vector<1x2xf32> -> vector<1x2xf32>
    %cst_7 = arith.constant 0.000000e+00 : f32
    %16 = vector.broadcast %cst_7 : f32 to vector<1x2xf32>
    %17 = arith.maximumf %15, %16 : vector<1x2xf32>
    %c0_8 = arith.constant 0 : index
    %c0_9 = arith.constant 0 : index
    %18 = vector.load %arg3[%c0_8, %c0_9] : memref<2x32xf32, #tpu.memory_space<vmem>>, vector<2x32xf32>
    %cst_10 = arith.constant dense<0.000000e+00> : vector<1x32xf32>
    %19 = tpu.matmul %17, %18, %cst_10 {dimension_numbers = #tpu.dot_dimension_numbers<[1], [0], [0], [1], [0, 0, 1, 1], [], []>} : vector<1x2xf32>, vector<2x32xf32>, vector<1x32xf32> -> vector<1x32xf32>
    %20 = arith.negf %19 : vector<1x32xf32>
    %21 = math.exp %20 : vector<1x32xf32>
    %cst_11 = arith.constant 1.000000e+00 : f32
    %22 = vector.broadcast %cst_11 : f32 to vector<1x32xf32>
    %23 = arith.addf %22, %21 : vector<1x32xf32>
    %24 = arith.divf %22, %23 : vector<1x32xf32>
    %25 = vector.shape_cast %24 : vector<1x32xf32> to vector<1x32x1xf32>
    %26 = vector.shape_cast %25 : vector<1x32x1xf32> to vector<1x32x1xf32>
    %27 = vector.broadcast %26 : vector<1x32x1xf32> to vector<1x32x256xf32>
    %c0_i32_12 = arith.constant 0 : i32
    %c256_i32_13 = arith.constant 256 : i32
    %28 = arith.muli %c0_i32_12, %c256_i32_13 : i32
    %29 = tpu.assume_multiple %28, 256 : i32
    %c0_14 = arith.constant 0 : index
    %c0_15 = arith.constant 0 : index
    %30 = arith.index_cast %29 : i32 to index
    %31 = vector.load %arg1[%c0_14, %c0_15, %30] : memref<1x32x256xf32, #tpu.memory_space<vmem>>, vector<1x32x256xf32>
    %32 = arith.mulf %31, %27 : vector<1x32x256xf32>
    %c0_16 = arith.constant 0 : index
    %c0_17 = arith.constant 0 : index
    %33 = arith.index_cast %29 : i32 to index
    %34 = vector.load %arg4[%c0_16, %c0_17, %33] : memref<1x32x256xf32, #tpu.memory_space<vmem>>, vector<1x32x256xf32>
    tpu.vector_store %arg4[%c0_16, %c0_17, %33], %32 {strides = array<i32>} : memref<1x32x256xf32, #tpu.memory_space<vmem>>, vector<1x32x256xf32>,
    %c1_i32_18 = arith.constant 1 : i32
    return
  }
  func.func @transform_0(%arg0: i32) -> (i32, i32, i32) {
    %c0_i32 = arith.constant 0 : i32
    %c0_i32_0 = arith.constant 0 : i32
    %c0_i32_1 = arith.constant 0 : i32
    return %arg0, %c0_i32, %c0_i32_0 : i32, i32, i32
  }
  func.func @transform_1(%arg0: i32) -> (i32, i32) {
    %c0_i32 = arith.constant 0 : i32
    %c0_i32_0 = arith.constant 0 : i32
    %c0_i32_1 = arith.constant 0 : i32
    return %c0_i32, %c0_i32_0 : i32, i32
  }
  func.func @transform_2(%arg0: i32) -> (i32, i32) {
    %c0_i32 = arith.constant 0 : i32
    %c0_i32_0 = arith.constant 0 : i32
    %c0_i32_1 = arith.constant 0 : i32
    return %c0_i32, %c0_i32_0 : i32, i32
  }
  func.func @transform_3(%arg0: i32) -> (i32, i32, i32) {
    %c0_i32 = arith.constant 0 : i32
    %c0_i32_0 = arith.constant 0 : i32
    %c0_i32_1 = arith.constant 0 : i32
    return %arg0, %c0_i32, %c0_i32_0 : i32, i32, i32
  }
}

</mosaic_0001>

<bundles_post_ra>
// kernel: tpu_custom_call.1
= control target key start
LH: loop header
LB: loop body
LE: loop exit
PB: predicated region body
PF: predicated region fallthrough
CT: control target
= control target key end

     0   :  { %8 = vsyncpa [#allocation3], 0  ;;  %s827_s0 = inlined_call_operand.hbm [shape: f32[2,32,256], index: 0, kind: input, shape index: {}]   ;;  %s828_s1 = inlined_call_operand.vmem [shape: f32[32,2], index: 1, kind: input, shape index: {}]   ;;  %s829_s2 = inlined_call_operand.vmem [shape: f32[2,32], index: 2, kind: input, shape index: {}]   ;;  %s830_s3 = inlined_call_operand.hbm [shape: f32[2,32,256], index: 3, kind: output, shape index: {}]  }
   0x1   :  { %10 = vsyncpa [#allocation3 + $0x1], 0 }
   0x2   :  { %11 = vsyncpa [#allocation4], 0 }
   0x3   :  { %13 = vsyncpa [#allocation4 + $0x1], 0  ;;  %s649_s12 = smov 0   ;;  %s651_s13 = smov 0  }
   0x4   :  { %s653_s14 = smov 0   ;;  %s655_s15 = smov 0  }
   0x5 LB: > { %s670_s16 = sadd.s32 4294967295, %s623_s15   ;;  %s448_s17 = sadd.s32 4294967294, %s623_s15   ;;  %s623_s15 = sphi %s655_s15, %s840_s15   ;;  %s619_s14 = sphi %s653_s14, %s839_s14   ;;  %s615_s13 = sphi %s651_s13, %s838_s13   ;;  %s611_s12 = sphi %s649_s12, %s837_s12  }
   0x6   : > { %s674_s18 = sadd.s32 1, %s623_s15   ;;  %s26_s19 = sadd.s32 1, %s619_s14 }
   0x7   : > { %s23_s20 = ssub.s32 %s623_s15, %s674_s18  ;;  %p33_p0 = scmp.ne.s32.totalorder %s619_s14, %s615_s13 }
   0x8   : > { %p24_p1 = scmp.eq.s32.totalorder %s23_s20, 0  ;;  %p34_p2 = scmp.eq.s32.totalorder %s623_s15, 0 }
   0x9   : > { %p39_p3 = scmp.ne.s32.totalorder %s615_s13, %s611_s12  ;;  %p40_p4 = scmp.eq.s32.totalorder %s670_s16, 0 }
   0xa   : > { %s686_s21 = scalar_select %p24_p1, %s619_s14, %s26_s19  }
   0xb   : > { %p688_p5 = por %p34_p2, %p33_p0  ;;  %p692_p6 = por %p40_p4, %p39_p3 }
   0xc   : > { %p105_p7 = scmp.eq.s32.totalorder %s670_s16, 1  ;;  %p111_p8 = scmp.eq.s32.totalorder %s448_s17, 1 }
   0xd   : > { %p480_p10 = scmp.lt.s32.totalorder %s623_s15, 2  ;;  %s137_s26 = sand.u32 1, %s619_s14  }
   0xe   : > { %p699_p11 = por %p105_p7, %p33_p0  ;;  %p703_p12 = por %p111_p8, %p39_p3 }
   0xf   : > { %s466_s27 = sshll.u32 %s623_s15, 6  ;;  %s451_s28 = sshll.u32 %s137_s26, 6 }
  0x10   : > { %s146_s4 = scalar_lea.hbm %s827_s0, %s466_s27  ;;  %s141_s6 = scalar_lea.vmem [#allocation2], %s451_s28 }
  0x11   : > { %s147_s5 = sshll.u32 %s146_s4, 4  ;;  %s149_s7 = sshll.u32 %s141_s6, 4  ;;  %s148_s5 = int_to_ptr.hbm [resolvable:$true] %s147_s5  ;;  %s150_s7 = int_to_ptr.vmem [resolvable:$true] %s149_s7 }
  0x12   : > { %p714_p13 = pnand %p480_p10, %p688_p5  ;;  %p454_p0 = scmp.ge.s32.totalorder %s623_s15, 1 }
  0x13   : > { %p157_p1 = scmp.lt.s32.totalorder %s623_s15, 3  ;;  %s138_s9 = scalar_lea.sflag [#allocation3], %s137_s26 }
  0x14   : > { %s527_s10 = sshra.s32 %s148_s5, 4  ;;  %p531_p3 = pneg %p714_p13  ;;  %s528_s10 = int_to_ptr.hbm [resolvable:$true] %s527_s10 }
  0x15   : > { %s529_s11 = scalar_lea.hbm %s528_s10, 64  ;;  %s534_s20 = scalar_lea.hbm %s827_s0, 128 }
  0x16   : > { %p530_p2 = scmp.ne.s32.totalorder %s528_s10, %s529_s11  ;;  %p535_p5 = scmp.lt.s32.totalorder %s528_s10, %s827_s0 }
  0x17   : > { %p536_p8 = scmp.lt.s32.totalorder %s534_s20, %s529_s11 }
  0x18   : > { %p532_p4 = pnand %p531_p3, %p530_p2 }
  0x19   : > { %p537_p10 = por %p536_p8, %p535_p5 }
  0x1a   : > { %p533_p7 = pneg %p532_p4 }
  0x1c   : > { %p538_p9 = pnand %p537_p10, %p533_p7 }
  0x1e   : > { %541 = shalt.err (!%p538_p9)
}
  0x1f   : > { %s625_s26 = smov 256   ;;  %s626_s28 = smov 16  }
  0x20   : > { %475 = dma.hbm_to_vmem [thread:$0]  (!%p714_p13), %s148_s5, 1024, %s150_s7, %s138_s9, %s625_s26, %s625_s26, %s626_s28  }
  0x21   : > { %p158_p2 = pnand %p454_p0, %p157_p1 }
  0x22   : > { %s735_s29 = sand.u32 (!%p158_p2), 1, %s615_s13  }
  0x23   : > { %161 = sbr.rel (%p158_p2) target bundleno = 583 (0x247), region = 32  ;;  %s455_s30 = sshll.u32 (!%p158_p2), %s735_s29, 6 }
  0x24   : > { %s164_s4 = scalar_lea.sflag (!%p158_p2), [#allocation3], %s735_s29  ;;  %s167_s6 = scalar_lea.vmem (!%p158_p2), [#allocation2], %s455_s30 }
  0x28   : > { %602 = dma.done.wait (%p692_p6), %s164_s4, 1024  }
  0x29   : > { %604 = vsyncadd (%p692_p6), %s164_s4, 4294966272  ;;  %v745_v0 = vld [vmem:[%s167_s6] sm:$0xff]  ;;  %v747_v1 = vld [vmem:[%s167_s6 + $0x8] sm:$0xff]  ;;  %v231_v16 = vlaneseq  ;;  %vm236_vm0 = vcmask 130112   ;;  %vm240_vm1 = vcmask 195712   ;;  %vm244_vm2 = vcmask 261312  }
  0x2a   : > { %v749_v2 = vld [vmem:[%s167_s6 + $0x20] sm:$0xff]  ;;  %v203_v3 = vadd.f32 %v747_v1, %v745_v0  ;;  %v753_v4 = vld [vmem:[%s167_s6 + $0x28] sm:$0xff]  ;;  %v757_v6 = vld [vmem:[%s167_s6 + $0x10] sm:$0xff]  ;;  %vm246_vm3 = vcmask 261120   ;;  %vm275_vm4 = vcmask 1041408   ;;  %vm271_vm5 = vcmask 15360  }
  0x2b   : > { %v205_v5 = vadd.f32 %v753_v4, %v749_v2  ;;  %v759_v7 = vld [vmem:[%s167_s6 + $0x18] sm:$0xff]  ;;  %v761_v8 = vld [vmem:[%s167_s6 + $0x30] sm:$0xff]  ;;  %v224_v14 = vld [vmem:[%s828_s1 + $0x8] sm:$0xff]  ;;  %v232_v19 = vand.u32 127, %v231_v16  ;;  %v320_v39 = vshrl.u32 %v231_v16, 7  ;;  %s190_s22 = scalar_lea.vmem [#allocation5], %s455_s30 }
  0x2c   : > { %207 = vadd.xlane.f32.xlu0 %v203_v3  ;;  %v763_v9 = vld [vmem:[%s167_s6 + $0x38] sm:$0xff]  ;;  %v204_v10 = vadd.f32 %v759_v7, %v757_v6  ;;  %v225_v13 = vld [vmem:[%s828_s1 + $0x10] sm:$0xff]  ;;  %v223_v15 = vld [vmem:[%s828_s1] sm:$0xff]  ;;  %s467_s27 = sshll.u32 %s670_s16, 6  ;;  %s372_s6 = sshll.u32 %s190_s22, 4  ;;  %s373_s6 = int_to_ptr.vmem [resolvable:$true] %s372_s6 }
  0x2d   : > { %211 = vadd.xlane.f32.xlu1 %v205_v5  ;;  %v206_v11 = vadd.f32 %v763_v9, %v761_v8  ;;  %v226_v12 = vld [vmem:[%s828_s1 + $0x18] sm:$0xff]  ;;  %v234_v21 = vadd.s32 4294967288, %v232_v19  ;;  %v238_v22 = vadd.s32 4294967280, %v232_v19  ;;  %v242_v25 = vadd.s32 4294967272, %v232_v19  ;;  %v270_v36 = vld [vmem:[%s829_s2] sm:$0x3]  ;;  %518 = vset.pattern.permute.xlu2 %v320_v39  ;;  %s371_s4 = scalar_lea.hbm %s830_s3, %s467_s27 }
  0x2e   : > { %261 = vmatpush.msra.mxu0 %v226_v12  ;;  %458 = vmatpush.msk.msra.mxu1 %vm275_vm4, %v270_v36  ;;  %v339_v40 = vadd.s32 24, %v320_v39  ;;  %v333_v41 = vadd.s32 16, %v320_v39  ;;  %v327_v57 = vadd.s32 8, %v320_v39  ;;  %s374_s23 = sshll.u32 %s371_s4, 4  ;;  %s360_s16 = scalar_lea.sflag [#allocation4], %s735_s29  ;;  %s375_s23 = int_to_ptr.hbm [resolvable:$true] %s374_s23 }
  0x2f   : > { %s571_s30 = sshra.s32 %s375_s23, 4  ;;  %s577_s9 = scalar_lea.hbm %s830_s3, 128  ;;  %s572_s30 = int_to_ptr.hbm [resolvable:$true] %s571_s30 }
  0x30   : > { %262 = vmatpush.msra.mxu0 %v225_v13  ;;  %521 = vset.pattern.permute.xlu1 %v339_v40  ;;  %s573_s5 = scalar_lea.hbm %s572_s30, 64  ;;  %p578_p0 = scmp.lt.s32.totalorder %s572_s30, %s830_s3 }
  0x31   : > { %520 = vset.pattern.permute.xlu0 %v333_v41  ;;  %p574_p6 = scmp.ne.s32.totalorder %s572_s30, %s573_s5  ;;  %p579_p1 = scmp.lt.s32.totalorder %s577_s9, %s573_s5 }
  0x32   : > { %263 = vmatpush.msra.mxu0 %v224_v14 }
  0x33   : > { %p575_p9 = pnand %p574_p6, %p699_p11  ;;  %p580_p3 = por %p579_p1, %p578_p0 }
  0x34   : > { %209 = vadd.xlane.f32.xlu0 %v204_v10  ;;  %264 = vmatpush.msra.mxu0 %v223_v15 }
  0x35   : > { %213 = vadd.xlane.f32.xlu1 %v206_v11  ;;  %p576_p13 = pneg %p575_p9 }
  0x37   : > { %p581_p4 = pnand %p580_p3, %p576_p13 }
  0x9f   : > { %v208_v17 = vpop.xlane.xlu0 %207 }
  0xa0   : > { %v212_v18 = vpop.xlane.xlu1 %211  ;;  %v219_v20 = vmul.f32 0.00390625, %v208_v17 }
  0xa1   : > { %v221_v23 = vmul.f32 0.00390625, %v212_v18 }
  0xa2   : > { %v233_v29 = vperm.slane %v219_v20, %v232_v19 }
  0xa3   : > { %v239_v31 = vperm.slane %v221_v23, %v238_v22 }
  0xa7   : > { %v210_v24 = vpop.xlane.xlu0 %209 }
  0xa8   : > { %v220_v26 = vmul.f32 0.00390625, %v210_v24  ;;  %v214_v27 = vpop.xlane.xlu1 %213 }
  0xa9   : > { %v222_v28 = vmul.f32 0.00390625, %v214_v27 }
  0xaa   : > { %v235_v30 = vperm.slane %v220_v26, %v234_v21 }
  0xab   : > { %v243_v32 = vperm.slane %v222_v28, %v242_v25 }
  0xac   : > { %v237_v33 = vsel %vm236_vm0, %v235_v30, %v233_v29 }
  0xad   : > { %v241_v34 = vsel %vm240_vm1, %v239_v31, %v237_v33 }
  0xae   : > { %v245_v35 = vsel %vm244_vm2, %v243_v32, %v241_v34 }
  0xaf   : > { %457 = vmatmul.msk.f32.vlgmr.msra.gmra.mxu0 %vm246_vm3, %v245_v35 }
 0x12c   : > { %v266_v37 = vpop.f32.mrf.mxu0 }
 0x12d   : > { %v269_v38 = vmax.f32 %v266_v37, 0.0 }
 0x12f   : > { %459 = vmatmul.msk.f32.vlgmr.msra.gmra.mxu1 %vm271_vm5, %v269_v38 }
 0x1ac   : > { %v296_v42 = vpop.f32.mrf.mxu1 }
 0x1ad   : > { %v460_v43 = vmul.f32 -1.442695, %v296_v42 }
 0x1af   : > { %523 = vpow2.f32 %v460_v43 }
 0x1b5   : > { %v524_v44 = vpop.eup %523 }
 0x1b6   : > { %v302_v45 = vadd.f32 1.0, %v524_v44 }
 0x1b8   : > { %525 = vrcp.f32 %v302_v45  ;;  %v314_v49 = vand.u32 2147483648, %v302_v45  ;;  %v312_v51 = vand.u32 2147483647, %v302_v45  ;;  %vm308_vm7 = vweird.f32 %v302_v45 }
 0x1ba   : > { %v315_v53 = vor.u32 1.1754944e-38, %v314_v49  ;;  %vm313_vm9 = vcmp.eq.f32.partialorder %v312_v51, 8.507059e+37 }
 0x1be   : > { %v526_v46 = vpop.eup %525 }
 0x1bf   : > { %v304_v47 = vmul.f32 %v526_v46, %v302_v45  ;;  %vm309_vm6 = vweird.f32 %v526_v46 }
 0x1c0   : > { %vm310_vm8 = vmor %vm308_vm7, %vm309_vm6 }
 0x1c1   : > { %v305_v48 = vsub.f32 1.0, %v304_v47 }
 0x1c3   : > { %v306_v50 = vmul.f32 %v526_v46, %v305_v48 }
 0x1c5   : > { %v307_v52 = vadd.f32 %v526_v46, %v306_v50 }
 0x1c7   : > { %v311_v54 = vsel %vm310_vm8, %v526_v46, %v307_v52 }
 0x1c8   : > { %v316_v55 = vsel %vm313_vm9, %v315_v53, %v311_v54 }
 0x1c9   : > { %v318_v56 = vperm.slane %v316_v55, 0 }
 0x1cb   : > { %341 = vperm.xlu1 %521, %v318_v56   ;;  %335 = vperm.xlu0 %520, %v318_v56  }
 0x1cc   : > { %323 = vperm.xlu2 %518, %v318_v56  }
 0x1d3   : > { %522 = vset.pattern.permute.xlu0 %v339_v40 }
 0x1d4   : > { %519 = vset.pattern.permute.xlu2 %v327_v57 }
 0x1dc   : > { %329 = vperm.xlu2 %519, %v318_v56  }
 0x226   : > { %v324_v58 = vpop.permute.xlu2 %323 }
 0x227   : > { %v343_v59 = vmul.f32 %v324_v58, %v745_v0  ;;  %v344_v60 = vmul.f32 %v324_v58, %v747_v1 }
 0x229   : > { %351 = vst [vmem:[%s190_s22] sm:$0xff] %v343_v59 }
 0x22a   : > { %352 = vst [vmem:[%s190_s22 + $0x8] sm:$0xff] %v344_v60 }
 0x236   : > { %v330_v61 = vpop.permute.xlu2 %329 }
 0x237   : > { %v345_v62 = vmul.f32 %v330_v61, %v757_v6  ;;  %v346_v63 = vmul.f32 %v330_v61, %v759_v7 }
 0x239   : > { %353 = vst [vmem:[%s190_s22 + $0x10] sm:$0xff] %v345_v62 }
 0x23a   : > { %354 = vst [vmem:[%s190_s22 + $0x18] sm:$0xff] %v346_v63 }
 0x23d   : > { %v342_v0 = vpop.permute.xlu1 %341  ;;  %v336_v1 = vpop.permute.xlu0 %335 }
 0x23e   : > { %v349_v3 = vmul.f32 %v342_v0, %v761_v8  ;;  %v350_v5 = vmul.f32 %v342_v0, %v763_v9  ;;  %v347_v6 = vmul.f32 %v336_v1, %v749_v2  ;;  %v348_v7 = vmul.f32 %v336_v1, %v753_v4 }
 0x240   : > { %357 = vst [vmem:[%s190_s22 + $0x30] sm:$0xff] %v349_v3 }
 0x241   : > { %358 = vst [vmem:[%s190_s22 + $0x38] sm:$0xff] %v350_v5 }
 0x242   : > { %355 = vst [vmem:[%s190_s22 + $0x20] sm:$0xff] %v347_v6 }
 0x243   : > { %356 = vst [vmem:[%s190_s22 + $0x28] sm:$0xff] %v348_v7 }
 0x244   : > { %584 = shalt.err (!%p581_p4)
}
 0x245   : > { %s627_s29 = smov 256   ;;  %s628_s17 = smov 16  }
 0x246   : > { %470 = dma.vmem_to_hbm [thread:$0]  (%p699_p11), %s373_s6, 1024, %s375_s23, %s360_s16, %s627_s29, %s627_s29, %s628_s17  }
 0x247 PF: > { %s389_s19 = sand.u32 1, %s611_s12   ;;  %p836_p7 = scmp.ge.s32.totalorder %s623_s15, 2 }
 0x248   : > { %s390_s20 = scalar_lea.sflag [#allocation4], %s389_s19 }
 0x249   : > { %p477_p5 = pnand %p836_p7, %p703_p12 }
 0x24b   : > { %p478_p8 = pneg %p477_p5 }
 0x24d   : > { %606 = dma.done.wait (%p478_p8), %s390_s20, 1024  }
 0x24e   : > { %608 = vsyncadd (%p478_p8), %s390_s20, 4294966272  ;;  %p16_p10 = scmp.ge.s32.totalorder %s674_s18, 4   ;;  %s837_s12 = smov %s615_s13 }
 0x24f   : > { %s838_s13 = smov %s619_s14  ;;  %s839_s14 = smov %s686_s21 }
 0x250   : > { %s840_s15 = smov %s674_s18  ;;  %18 = sbr.rel (!%p16_p10) target bundleno = 5 (0x5), region = 77 }
 0x255   :  { %396 = vsyncpa [#allocation3], 1 }
 0x256   :  { %398 = vsyncpa [#allocation3 + $0x1], 1 }
 0x257   :  { %399 = vsyncpa [#allocation4], 1 }
 0x258   :  { %401 = vsyncpa [#allocation4 + $0x1], 1 }

</bundles_post_ra>
